<compile_context>
chip_gen: v7x
topology: tpu7x:2x2x1
jax: 0.10.0
libtpu: 0.0.40
codegen_flags: <defaults>
</compile_context>

<pallas_src>
import jax
import jax.numpy as jnp
from jax.experimental import pallas as pl
from jax.experimental.pallas import tpu as pltpu


LANE_WIDTH = 1024   # lane-dense last dim (multiple of 128)
BLOCK_ROWS = 512    # rows per block (multiple of 8; 2 MiB f32 per buffer)


def _add_zero_kernel(x_ref, o_ref):
    # Elementwise x + 0.0 in the input dtype (preserves aten.add semantics,
    # including -0.0 + 0.0 == +0.0).
    o_ref[...] = x_ref[...] + jnp.asarray(0.0, dtype=x_ref.dtype)


@jax.jit
def pattern_module_forward(x):
    """Equivalent of PatternModule.forward(x) = aten.add.Tensor(x, 0.0)."""
    orig_shape = x.shape
    dtype = x.dtype
    total = x.size

    # Flatten and (only if necessary) pad to a lane-dense 2-D slab.
    flat = x.reshape(-1)
    padded = pl.cdiv(total, LANE_WIDTH) * LANE_WIDTH
    if padded != total:
        flat = jnp.pad(flat, (0, padded - total))
    num_rows = padded // LANE_WIDTH
    x2d = flat.reshape(num_rows, LANE_WIDTH)

    # Row-block size: full extent when small (always legal, single grid step),
    # otherwise a fixed 512-row tile (divisible by 8 -> (8,128) rule holds).
    block_rows = num_rows if num_rows < BLOCK_ROWS else BLOCK_ROWS
    grid = (pl.cdiv(num_rows, block_rows),)

    out2d = pl.pallas_call(
        _add_zero_kernel,
        out_shape=jax.ShapeDtypeStruct((num_rows, LANE_WIDTH), dtype),
        grid=grid,
        in_specs=[pl.BlockSpec((block_rows, LANE_WIDTH), lambda i: (i, 0))],
        out_specs=pl.BlockSpec((block_rows, LANE_WIDTH), lambda i: (i, 0)),
        compiler_params=pltpu.CompilerParams(
            dimension_semantics=("parallel",),
        ),
    )(x2d)

    out_flat = out2d.reshape(-1)
    if padded != total:
        out_flat = out_flat[:total]
    return out_flat.reshape(orig_shape)


if __name__ == "__main__":
    key = jax.random.PRNGKey(0)
    # Small 4-D input consistent with a generic tensor module (NCHW).
    x = jax.random.normal(key, (2, 4, 16, 16), dtype=jnp.float32)

    out = pattern_module_forward(x)
    jax.block_until_ready(out)

    # Correctness check against the reference (x + 0.0).
    ref = x + jnp.float32(0.0)
    assert out.shape == x.shape and out.dtype == x.dtype
    assert bool(jnp.all(out == ref))

    print("KERNEL_OK")
</pallas_src>

<mosaic_0001>
module attributes {stable_mosaic.version = 11 : i64} {
  func.func @_add_zero_kernel(%arg0: i32, %arg1: memref<2x1024xf32, #tpu.memory_space<vmem>>, %arg2: memref<2x1024xf32, #tpu.memory_space<vmem>>) attributes {dimension_semantics = [#tpu.dimension_semantics<parallel>], iteration_bounds = array<i64: 1>, scalar_prefetch = 0 : i64, scratch_operands = 0 : i64, tpu.core_type = #tpu.core_type<tc>, window_params = [{transform_indices = @transform_0, window_bounds = array<i64: 2, 1024>}, {transform_indices = @transform_1, window_bounds = array<i64: 2, 1024>}]} {
    %c0 = arith.constant 0 : index
    %c0_0 = arith.constant 0 : index
    %0 = vector.load %arg1[%c0, %c0_0] : memref<2x1024xf32, #tpu.memory_space<vmem>>, vector<2x1024xf32>
    %cst = arith.constant 0.000000e+00 : f32
    %1 = vector.broadcast %cst : f32 to vector<2x1024xf32>
    %2 = arith.addf %0, %1 : vector<2x1024xf32>
    %c0_1 = arith.constant 0 : index
    %c0_2 = arith.constant 0 : index
    %3 = vector.load %arg2[%c0_1, %c0_2] : memref<2x1024xf32, #tpu.memory_space<vmem>>, vector<2x1024xf32>
    tpu.vector_store %arg2[%c0_1, %c0_2], %2 {strides = array<i32>} : memref<2x1024xf32, #tpu.memory_space<vmem>>, vector<2x1024xf32>,
    return
  }
  func.func @transform_0(%arg0: i32) -> (i32, i32) {
    %c0_i32 = arith.constant 0 : i32
    %c0_i32_0 = arith.constant 0 : i32
    return %arg0, %c0_i32 : i32, i32
  }
  func.func @transform_1(%arg0: i32) -> (i32, i32) {
    %c0_i32 = arith.constant 0 : i32
    %c0_i32_0 = arith.constant 0 : i32
    return %arg0, %c0_i32 : i32, i32
  }
}

</mosaic_0001>

<bundles_post_ra>
// kernel: pattern_module_forward.1
= control target key start
LH: loop header
LB: loop body
LE: loop exit
PB: predicated region body
PF: predicated region fallthrough
CT: control target
= control target key end

     0   :  { %s40_s0 = inlined_call_operand.vmem [shape: f32[2,1024], index: 0, kind: input, shape index: {}]   ;;  %s41_s1 = inlined_call_operand.vmem [shape: f32[2,1024], index: 1, kind: output, shape index: {}]  }
   0x1   :  { %v8_v0 = vld [vmem:[%s40_s0] sm:$0xff]  ;;  %v9_v1 = vld [vmem:[%s40_s0 + $0x8] sm:$0xff] }
   0x2   :  { %12 = vst [vmem:[%s41_s1] sm:$0xff] %v8_v0  ;;  %13 = vst [vmem:[%s41_s1 + $0x8] sm:$0xff] %v9_v1 }

</bundles_post_ra>
